<compile_context>
chip_gen: v5e
topology: v5e:2x2
jax: 0.10.0
libtpu: 0.0.40
codegen_flags: <defaults>
</compile_context>

<pallas_src>
import functools

import jax
import jax.numpy as jnp
from jax.experimental import pallas as pl
from jax.experimental.pallas import tpu as pltpu


# ---------------------------------------------------------------------------
# Tunables / generation-aware VMEM budgets
# ---------------------------------------------------------------------------
_MAX_HW_TILE = 16384


def _round_up(a, b):
    return ((a + b - 1) // b) * b


@functools.lru_cache(maxsize=1)
def _vmem_budgets():
    """(vmem_limit_bytes, max_fused_bytes, tile_budget_bytes), per-generation.

    128 MiB chips (v5e/v6e): ~112 / 96 / 48 MiB.
    64  MiB chips (v7x):     ~48  / 44 / 24 MiB.
    """
    mib = 1024 * 1024
    cap = 64 * mib  # conservative fallback (v7x-safe)
    try:
        info = pltpu.get_tpu_info()
        cap_attr = getattr(info, "vmem_capacity_bytes", None)
        if cap_attr:
            cap = int(cap_attr)
    except Exception:
        pass
    vmem_limit = min(cap - 16 * mib, (7 * cap) // 8)
    max_fused = min((3 * cap) // 4, cap - 20 * mib)
    tile_budget = (3 * cap) // 8
    return vmem_limit, max_fused, tile_budget


def _pick_hw_tile(C, HW, itemsize, budget_bytes, buffers):
    """Largest 128-multiple spatial tile such that `buffers` copies of
    (C, tile) fit the per-phase VMEM budget."""
    max_tile = budget_bytes // (buffers * C * itemsize)
    max_tile = max(128, (max_tile // 128) * 128)
    return min(max_tile, _MAX_HW_TILE, _round_up(HW, 128))


# ---------------------------------------------------------------------------
# Squeeze-excite bottleneck MLP on a single (C,1) vector (VPU/XLU only).
# ---------------------------------------------------------------------------
def _squeeze_excite(y, w1t, b1, w2, b2):
    """y: (C,1) f32; w1t: (C,R); b1: (1,R); w2: (C,R); b2: (C,1) -> (C,1)."""
    z = jnp.sum(w1t * y, axis=0, keepdims=True) + b1      # (1, R)
    z = jnp.where(z >= 0, z, 0.1 * z)                     # LeakyReLU(0.1)
    s = jnp.sum(w2 * z, axis=1, keepdims=True) + b2       # (C, 1)
    return 1.0 / (1.0 + jnp.exp(-s))                      # exact sigmoid


# ---------------------------------------------------------------------------
# Fused kernel: whole (C, HW) slab per batch item (used when it fits VMEM).
# ---------------------------------------------------------------------------
def _fused_kernel(x_ref, w1t_ref, b1_ref, w2_ref, b2_ref, o_ref, *, inv_hw):
    x = x_ref[0]                                          # (C, HW) input dtype
    # f32-accumulated spatial mean over the true HW lanes (no padding).
    y = jnp.sum(x.astype(jnp.float32), axis=-1, keepdims=True) * inv_hw
    s = _squeeze_excite(y, w1t_ref[...], b1_ref[...], w2_ref[...], b2_ref[...])
    # Rescale in the input dtype (no full f32 copy of the slab).
    o_ref[0] = (x * s.astype(x.dtype)).astype(o_ref.dtype)


# ---------------------------------------------------------------------------
# Two-phase kernels: spatially tiled reduction + rescale.
# ---------------------------------------------------------------------------
def _pool_kernel(x_ref, w1t_ref, b1_ref, w2_ref, b2_ref, s_ref, acc_ref, *,
                 inv_hw, hw, tile):
    t = pl.program_id(1)

    @pl.when(t == 0)
    def _():
        acc_ref[...] = jnp.zeros_like(acc_ref)

    xf = x_ref[0].astype(jnp.float32)                     # (C, tile)
    if hw % tile != 0:
        # Ragged last spatial tile: out-of-bounds lanes hold unspecified
        # data -- mask them before accumulating (VPU work, free under the
        # HBM-bound stream; no wrapper padding pass needed).
        lane = jax.lax.broadcasted_iota(jnp.int32, xf.shape, 1)
        valid = hw - t * tile
        xf = jnp.where(lane < valid, xf, 0.0)
    acc_ref[...] += jnp.sum(xf, axis=-1, keepdims=True)

    @pl.when(t == pl.num_programs(1) - 1)
    def _():
        y = acc_ref[...] * inv_hw                         # exact mean over HW
        s_ref[0] = _squeeze_excite(
            y, w1t_ref[...], b1_ref[...], w2_ref[...], b2_ref[...])


def _rescale_kernel(x_ref, s_ref, o_ref):
    x = x_ref[0]                                          # (C, tile)
    s = s_ref[0].astype(x.dtype)                          # (C, 1)
    # Ragged last tile: garbage input lanes are harmless -- the out-of-bounds
    # part of the store is dropped by the pipeline.
    o_ref[0] = (x * s).astype(o_ref.dtype)


# ---------------------------------------------------------------------------
# Wrapper
# ---------------------------------------------------------------------------
def ca_layer(x_nchw, w1, b1, w2, b2, *, force_two_phase=False, hw_tile=None):
    """x_nchw: (N, C, H, W); w1: (R, C); b1: (R,); w2: (C, R); b2: (C,)."""
    N, C, H, W = x_nchw.shape
    R = w1.shape[0]                        # bottleneck width (4 in this module)
    HW = H * W
    itemsize = jnp.dtype(x_nchw.dtype).itemsize
    inv_hw = 1.0 / float(HW)
    vmem_limit, max_fused_bytes, tile_budget = _vmem_budgets()

    # Parameters laid out so the bottleneck MLP is pure broadcast + reduce.
    w1t = jnp.asarray(w1, jnp.float32).T                  # (C, R)
    b1r = jnp.asarray(b1, jnp.float32).reshape(1, R)      # (1, R)
    w2f = jnp.asarray(w2, jnp.float32)                    # (C, R)
    b2c = jnp.asarray(b2, jnp.float32).reshape(C, 1)      # (C, 1)

    weight_specs = [
        pl.BlockSpec((C, R), lambda *idx: (0, 0)),        # w1t
        pl.BlockSpec((1, R), lambda *idx: (0, 0)),        # b1
        pl.BlockSpec((C, R), lambda *idx: (0, 0)),        # w2
        pl.BlockSpec((C, 1), lambda *idx: (0, 0)),        # b2
    ]

    # Free reshape (contiguous dim merge) -- no extra HBM traffic, no padding.
    x = x_nchw.reshape(N, C, HW)

    fused_bytes = 4 * C * HW * itemsize    # in + out, each double-buffered
    use_fused = (not force_two_phase) and fused_bytes <= max_fused_bytes

    if use_fused:
        out = pl.pallas_call(
            functools.partial(_fused_kernel, inv_hw=inv_hw),
            out_shape=jax.ShapeDtypeStruct((N, C, HW), x_nchw.dtype),
            grid=(N,),
            in_specs=[pl.BlockSpec((1, C, HW), lambda n: (n, 0, 0))] + weight_specs,
            out_specs=pl.BlockSpec((1, C, HW), lambda n: (n, 0, 0)),
            compiler_params=pltpu.CompilerParams(
                dimension_semantics=("parallel",),
                vmem_limit_bytes=vmem_limit),
            cost_estimate=pl.CostEstimate(
                flops=2 * N * C * HW,
                transcendentals=2 * N * C,
                bytes_accessed=2 * N * C * HW * itemsize),
        )(x, w1t, b1r, w2f, b2c)
        return out.reshape(N, C, H, W)

    # ---------------- two-phase path (slab does not fit / forced) -----------
    if hw_tile is not None:
        assert hw_tile % 128 == 0, "hw_tile must be a multiple of 128"
        pool_tile = rescale_tile = hw_tile
    else:
        # Pool phase only double-buffers the input (2 copies); rescale holds
        # in + out double-buffered (4 copies) -> pool tile can be ~2x larger.
        pool_tile = _pick_hw_tile(C, HW, itemsize, tile_budget, buffers=2)
        rescale_tile = _pick_hw_tile(C, HW, itemsize, tile_budget, buffers=4)

    t_pool = pl.cdiv(HW, pool_tile)
    t_res = pl.cdiv(HW, rescale_tile)

    # Phase 1: pooled channel sums -> squeeze-excite scale s, per batch item.
    s = pl.pallas_call(
        functools.partial(_pool_kernel, inv_hw=inv_hw, hw=HW, tile=pool_tile),
        out_shape=jax.ShapeDtypeStruct((N, C, 1), jnp.float32),
        grid=(N, t_pool),
        in_specs=[pl.BlockSpec((1, C, pool_tile), lambda n, t: (n, 0, t))]
                 + weight_specs,
        out_specs=pl.BlockSpec((1, C, 1), lambda n, t: (n, 0, 0)),
        scratch_shapes=[pltpu.VMEM((C, 1), jnp.float32)],
        compiler_params=pltpu.CompilerParams(
            dimension_semantics=("parallel", "arbitrary"),
            vmem_limit_bytes=vmem_limit),
        cost_estimate=pl.CostEstimate(
            flops=N * C * HW,
            transcendentals=2 * N * C,
            bytes_accessed=N * C * HW * itemsize),
    )(x, w1t, b1r, w2f, b2c)

    # Phase 2: stream x again and rescale; both grid axes parallel (megacore).
    out = pl.pallas_call(
        _rescale_kernel,
        out_shape=jax.ShapeDtypeStruct((N, C, HW), x_nchw.dtype),
        grid=(N, t_res),
        in_specs=[
            pl.BlockSpec((1, C, rescale_tile), lambda n, t: (n, 0, t)),
            pl.BlockSpec((1, C, 1), lambda n, t: (n, 0, 0)),
        ],
        out_specs=pl.BlockSpec((1, C, rescale_tile), lambda n, t: (n, 0, t)),
        compiler_params=pltpu.CompilerParams(
            dimension_semantics=("parallel", "parallel"),
            vmem_limit_bytes=vmem_limit),
        cost_estimate=pl.CostEstimate(
            flops=N * C * HW,
            transcendentals=0,
            bytes_accessed=2 * N * C * HW * itemsize),
    )(x, s)
    return out.reshape(N, C, H, W)


# ---------------------------------------------------------------------------
# Pure-JAX reference matching the PyTorch forward.
# ---------------------------------------------------------------------------
def _reference(x, w1, b1, w2, b2):
    y = jnp.mean(x, axis=(2, 3))                           # (N, C)
    z = y @ w1.T + b1                                      # (N, R)
    z = jnp.where(z >= 0, z, 0.1 * z)                      # LeakyReLU(0.1)
    s = jax.nn.sigmoid(z @ w2.T + b2)                      # (N, C)
    return x * s[:, :, None, None]


if __name__ == "__main__":
    key = jax.random.PRNGKey(0)
    k1, kb1, k2, kb2, kx = jax.random.split(key, 5)

    C = 8
    w1 = 0.2 * jax.random.normal(k1, (4, C), dtype=jnp.float32)   # conv C->4
    b1 = 0.1 * jax.random.normal(kb1, (4,), dtype=jnp.float32)
    w2 = 0.2 * jax.random.normal(k2, (C, 4), dtype=jnp.float32)   # conv 4->C
    b2 = 0.1 * jax.random.normal(kb2, (C,), dtype=jnp.float32)

    def check(name, N, H, W, **kw):
        x = jax.random.normal(jax.random.fold_in(kx, H * 1000 + W),
                              (N, C, H, W), dtype=jnp.float32)
        ref = _reference(x, w1, b1, w2, b2)
        out = jax.block_until_ready(ca_layer(x, w1, b1, w2, b2, **kw))
        assert out.shape == x.shape
        err = float(jnp.max(jnp.abs(out - ref)))
        assert err < 1e-5, f"{name}: max |err| = {err}"

    # Fused single-pass path, 128-aligned spatial extent.
    check("fused-aligned", N=2, H=16, W=16)
    # Fused path with HW % 128 != 0 (full-extent block, masked tail store,
    # no wrapper padding/slicing).
    check("fused-ragged", N=2, H=10, W=11)
    # Two-phase path, forced with a small tile: exercises multi-tile
    # accumulation and the in-kernel masking of the ragged last tile.
    check("two-phase-ragged", N=2, H=17, W=19, force_two_phase=True, hw_tile=128)

    print("KERNEL_OK")
</pallas_src>

<mosaic_0001>
module attributes {stable_mosaic.version = 11 : i64} {
  func.func @_fused_kernel(%arg0: i32, %arg1: memref<1x8x256xf32, #tpu.memory_space<vmem>>, %arg2: memref<8x4xf32, #tpu.memory_space<vmem>>, %arg3: memref<1x4xf32, #tpu.memory_space<vmem>>, %arg4: memref<8x4xf32, #tpu.memory_space<vmem>>, %arg5: memref<8x1xf32, #tpu.memory_space<vmem>>, %arg6: memref<1x8x256xf32, #tpu.memory_space<vmem>>) attributes {dimension_semantics = [#tpu.dimension_semantics<parallel>], iteration_bounds = array<i64: 2>, scalar_prefetch = 0 : i64, scratch_operands = 0 : i64, tpu.core_type = #tpu.core_type<tc>, window_params = [{transform_indices = @transform_0, window_bounds = array<i64: 1, 8, 256>}, {pipeline_mode = #tpu.pipeline_mode<synchronous>, transform_indices = @transform_1, window_bounds = array<i64: 8, 4>}, {pipeline_mode = #tpu.pipeline_mode<synchronous>, transform_indices = @transform_2, window_bounds = array<i64: 1, 4>}, {pipeline_mode = #tpu.pipeline_mode<synchronous>, transform_indices = @transform_3, window_bounds = array<i64: 8, 4>}, {pipeline_mode = #tpu.pipeline_mode<synchronous>, transform_indices = @transform_4, window_bounds = array<i64: 8, 1>}, {transform_indices = @transform_5, window_bounds = array<i64: 1, 8, 256>}]} {
    %c0 = arith.constant 0 : index
    %c0_0 = arith.constant 0 : index
    %c0_1 = arith.constant 0 : index
    %0 = vector.load %arg1[%c0, %c0_0, %c0_1] : memref<1x8x256xf32, #tpu.memory_space<vmem>>, vector<1x8x256xf32>
    %1 = vector.shape_cast %0 : vector<1x8x256xf32> to vector<8x256xf32>
    %cst = arith.constant dense<0.000000e+00> : vector<8xf32>
    %2 = vector.multi_reduction <add>, %1, %cst [1] : vector<8x256xf32> to vector<8xf32>
    %3 = vector.shape_cast %2 : vector<8xf32> to vector<8x1xf32>
    %cst_2 = arith.constant 3.906250e-03 : f32
    %4 = vector.broadcast %cst_2 : f32 to vector<8x1xf32>
    %5 = arith.mulf %3, %4 : vector<8x1xf32>
    %c0_3 = arith.constant 0 : index
    %c0_4 = arith.constant 0 : index
    %6 = vector.load %arg2[%c0_3, %c0_4] : memref<8x4xf32, #tpu.memory_space<vmem>>, vector<8x4xf32>
    %c0_5 = arith.constant 0 : index
    %c0_6 = arith.constant 0 : index
    %7 = vector.load %arg3[%c0_5, %c0_6] : memref<1x4xf32, #tpu.memory_space<vmem>>, vector<1x4xf32>
    %c0_7 = arith.constant 0 : index
    %c0_8 = arith.constant 0 : index
    %8 = vector.load %arg4[%c0_7, %c0_8] : memref<8x4xf32, #tpu.memory_space<vmem>>, vector<8x4xf32>
    %c0_9 = arith.constant 0 : index
    %c0_10 = arith.constant 0 : index
    %9 = vector.load %arg5[%c0_9, %c0_10] : memref<8x1xf32, #tpu.memory_space<vmem>>, vector<8x1xf32>
    %10 = vector.broadcast %5 : vector<8x1xf32> to vector<8x4xf32>
    %11 = arith.mulf %6, %10 : vector<8x4xf32>
    %cst_11 = arith.constant dense<0.000000e+00> : vector<4xf32>
    %12 = vector.multi_reduction <add>, %11, %cst_11 [0] : vector<8x4xf32> to vector<4xf32>
    %13 = vector.shape_cast %12 : vector<4xf32> to vector<1x4xf32>
    %14 = arith.addf %13, %7 : vector<1x4xf32>
    %cst_12 = arith.constant 0.000000e+00 : f32
    %15 = vector.broadcast %cst_12 : f32 to vector<1x4xf32>
    %16 = arith.cmpf oge, %14, %15 : vector<1x4xf32>
    %cst_13 = arith.constant 1.000000e-01 : f32
    %17 = vector.broadcast %cst_13 : f32 to vector<1x4xf32>
    %18 = arith.mulf %17, %14 : vector<1x4xf32>
    %19 = arith.select %16, %14, %18 : vector<1x4xi1>, vector<1x4xf32>
    %20 = vector.broadcast %19 : vector<1x4xf32> to vector<8x4xf32>
    %21 = arith.mulf %8, %20 : vector<8x4xf32>
    %cst_14 = arith.constant dense<0.000000e+00> : vector<8xf32>
    %22 = vector.multi_reduction <add>, %21, %cst_14 [1] : vector<8x4xf32> to vector<8xf32>
    %23 = vector.shape_cast %22 : vector<8xf32> to vector<8x1xf32>
    %24 = arith.addf %23, %9 : vector<8x1xf32>
    %cst_15 = arith.constant 0.000000e+00 : f32
    %25 = vector.broadcast %cst_15 : f32 to vector<8x1xf32>
    %26 = arith.subf %25, %24 : vector<8x1xf32>
    %27 = math.exp %26 : vector<8x1xf32>
    %cst_16 = arith.constant 1.000000e+00 : f32
    %28 = vector.broadcast %cst_16 : f32 to vector<8x1xf32>
    %29 = arith.addf %28, %27 : vector<8x1xf32>
    %cst_17 = arith.constant 1.000000e+00 : f32
    %30 = vector.broadcast %cst_17 : f32 to vector<8x1xf32>
    %31 = arith.divf %30, %29 : vector<8x1xf32>
    %32 = vector.broadcast %31 : vector<8x1xf32> to vector<8x256xf32>
    %33 = arith.mulf %1, %32 : vector<8x256xf32>
    %c0_18 = arith.constant 0 : index
    %c0_19 = arith.constant 0 : index
    %c0_20 = arith.constant 0 : index
    %34 = vector.load %arg6[%c0_18, %c0_19, %c0_20] : memref<1x8x256xf32, #tpu.memory_space<vmem>>, vector<1x8x256xf32>
    %35 = vector.shape_cast %34 : vector<1x8x256xf32> to vector<8x256xf32>
    %36 = vector.shape_cast %33 : vector<8x256xf32> to vector<1x8x256xf32>
    tpu.vector_store %arg6[%c0_18, %c0_19, %c0_20], %36 {strides = array<i32>} : memref<1x8x256xf32, #tpu.memory_space<vmem>>, vector<1x8x256xf32>,
    return
  }
  func.func @transform_0(%arg0: i32) -> (i32, i32, i32) {
    %c0_i32 = arith.constant 0 : i32
    %c0_i32_0 = arith.constant 0 : i32
    %c0_i32_1 = arith.constant 0 : i32
    return %arg0, %c0_i32, %c0_i32_0 : i32, i32, i32
  }
  func.func @transform_1(%arg0: i32) -> (i32, i32) {
    %c0_i32 = arith.constant 0 : i32
    %c0_i32_0 = arith.constant 0 : i32
    %c0_i32_1 = arith.constant 0 : i32
    return %c0_i32, %c0_i32_0 : i32, i32
  }
  func.func @transform_2(%arg0: i32) -> (i32, i32) {
    %c0_i32 = arith.constant 0 : i32
    %c0_i32_0 = arith.constant 0 : i32
    %c0_i32_1 = arith.constant 0 : i32
    return %c0_i32, %c0_i32_0 : i32, i32
  }
  func.func @transform_3(%arg0: i32) -> (i32, i32) {
    %c0_i32 = arith.constant 0 : i32
    %c0_i32_0 = arith.constant 0 : i32
    %c0_i32_1 = arith.constant 0 : i32
    return %c0_i32, %c0_i32_0 : i32, i32
  }
  func.func @transform_4(%arg0: i32) -> (i32, i32) {
    %c0_i32 = arith.constant 0 : i32
    %c0_i32_0 = arith.constant 0 : i32
    %c0_i32_1 = arith.constant 0 : i32
    return %c0_i32, %c0_i32_0 : i32, i32
  }
  func.func @transform_5(%arg0: i32) -> (i32, i32, i32) {
    %c0_i32 = arith.constant 0 : i32
    %c0_i32_0 = arith.constant 0 : i32
    %c0_i32_1 = arith.constant 0 : i32
    return %arg0, %c0_i32, %c0_i32_0 : i32, i32, i32
  }
}

</mosaic_0001>

<bundles_post_ra>
// kernel: tpu_custom_call.1
= control target key start
LH: loop header
LB: loop body
LE: loop exit
PB: predicated region body
PF: predicated region fallthrough
CT: control target
= control target key end

     0   :  { %10 = vsyncpa [#allocation3], 0  ;;  %s610_s0 = inlined_call_operand.vmem [shape: f32[2,8,256], index: 0, kind: input, shape index: {}]   ;;  %s611_s1 = inlined_call_operand.vmem [shape: f32[8,4], index: 1, kind: input, shape index: {}]   ;;  %s612_s2 = inlined_call_operand.vmem [shape: f32[1,4], index: 2, kind: input, shape index: {}]   ;;  %s613_s3 = inlined_call_operand.vmem [shape: f32[8,4], index: 3, kind: input, shape index: {}]   ;;  %s614_s4 = inlined_call_operand.vmem [shape: f32[8,1], index: 4, kind: input, shape index: {}]   ;;  %s615_s5 = inlined_call_operand.hbm [shape: f32[2,8,256], index: 5, kind: output, shape index: {}]  }
   0x1   :  { %12 = vsyncpa [#allocation3 + $0x1], 0  ;;  %s511_s18 = smov 0   ;;  %s513_s19 = smov 0  }
   0x2   :  { %s515_s20 = smov 0   ;;  %s517_s21 = smov 0  }
   0x3 LB: > { %s532_s22 = sadd.s32 4294967295, %s478_s21   ;;  %s356_s23 = sadd.s32 4294967294, %s478_s21   ;;  %s478_s21 = sphi %s517_s21, %s621_s21   ;;  %s474_s20 = sphi %s515_s20, %s620_s20   ;;  %s470_s19 = sphi %s513_s19, %s619_s19   ;;  %s466_s18 = sphi %s511_s18, %s618_s18  }
   0x4   : > { %s536_s24 = sadd.s32 1, %s478_s21   ;;  %s135_s25 = sadd.s32 1, %s474_s20 }
   0x5   : > { %s132_s26 = ssub.s32 %s478_s21, %s536_s24  ;;  %p145_p0 = scmp.ne.s32.totalorder %s474_s20, %s470_s19 }
   0x6   : > { %p133_p1 = scmp.eq.s32.totalorder %s132_s26, 0  ;;  %p146_p2 = scmp.eq.s32.totalorder %s532_s22, 1 }
   0x7   : > { %p151_p3 = scmp.ne.s32.totalorder %s470_s19, %s466_s18  ;;  %p152_p4 = scmp.eq.s32.totalorder %s356_s23, 1 }
   0x8   : > { %s547_s27 = scalar_select %p133_p1, %s474_s20, %s135_s25  }
   0x9   : > { %p549_p5 = por %p146_p2, %p145_p0  ;;  %p553_p6 = por %p152_p4, %p151_p3 }
   0xa   : > { %p359_p7 = scmp.ge.s32.totalorder %s478_s21, 1  ;;  %p190_p8 = scmp.lt.s32.totalorder %s478_s21, 3 }
   0xc   : > { %p191_p9 = pnand %p359_p7, %p190_p8 }
   0xd   : > { %p218_p10 = scmp.lt.s32.totalorder (!%p191_p9), %s532_s22, 1  ;;  %s215_s23 = sand.u32 (!%p191_p9), 1, %s470_s19  }
   0xe   : > { %194 = sbr.rel (%p191_p9) target bundleno = 438 (0x1b6), region = 40  ;;  %s360_s25 = sshll.u32 (!%p191_p9), %s215_s23, 4 }
   0xf   : > { %s369_s26 = sshll.u32 (!%p191_p9), %s532_s22, 4  ;;  %s217_s8 = scalar_lea.vmem (!%p191_p9), [#allocation2], %s360_s25 }
  0x10   : > { %s292_s7 = scalar_lea.hbm (!%p191_p9), %s615_s5, %s369_s26  ;;  %s281_s11 = scalar_lea.sflag (!%p191_p9), [#allocation3], %s215_s23 }
  0x11   : > { %s296_s10 = sshll.u32 (!%p191_p9), %s292_s7, 4  ;;  %s436_s15 = scalar_lea.hbm (!%p191_p9), %s615_s5, 32  ;;  %s297_s10 = int_to_ptr.hbm [resolvable:$true] %s296_s10 }
  0x12   : > { %s430_s12 = sshra.s32 (!%p191_p9), %s297_s10, 4  ;;  %s431_s12 = int_to_ptr.hbm [resolvable:$true] %s430_s12 }
  0x13   : > { %s219_s30 = scalar_select %p218_p10, %s532_s22, 1  ;;  %v229_v3 = vld [vmem:[%s611_s1] sm:$0xff]  ;;  %vm234_vm0 = vcmask 31744   ;;  %v480_v22 = vmov 0  }
  0x14   : > { %v230_v13 = vld [vmem:[%s612_s2] sm:$0x1]  ;;  %410 = vset.pattern.permute.xlu1 %v480_v22  ;;  %411 = vset.pattern.permute.xlu0 %v480_v22  ;;  %s432_s13 = scalar_lea.hbm %s431_s12, 16  ;;  %p437_p0 = scmp.lt.s32.totalorder %s431_s12, %s615_s5 }
  0x15   : > { %s368_s6 = sshll.u32 %s219_s30, 4  ;;  %v231_v17 = vld [vmem:[%s613_s3] sm:$0xff]  ;;  %p433_p11 = scmp.ne.s32.totalorder %s431_s12, %s432_s13 }
  0x16   : > { %s222_s9 = scalar_lea.vmem %s610_s0, %s368_s6  ;;  %v232_v23 = vld [vmem:[%s614_s4] sm:$0xff]  ;;  %p438_p1 = scmp.lt.s32.totalorder %s436_s15, %s432_s13 }
  0x17   : > { %v223_v0 = vld [vmem:[%s222_s9] sm:$0xff]  ;;  %v224_v1 = vld [vmem:[%s222_s9 + $0x8] sm:$0xff]  ;;  %s294_s9 = sshll.u32 %s217_s8, 4  ;;  %p434_p12 = pnand %p433_p11, %p549_p5  ;;  %s295_s9 = int_to_ptr.vmem [resolvable:$true] %s294_s9 }
  0x18   : > { %v225_v2 = vadd.f32 %v224_v1, %v223_v0  ;;  %p439_p2 = por %p438_p1, %p437_p0 }
  0x19   : > { %p435_p13 = pneg %p434_p12 }
  0x1a   : > { %226 = vadd.xlane.f32.xlu0 %v225_v2 }
  0x1b   : > { %p440_p3 = pnand %p439_p2, %p435_p13 }
  0x8d   : > { %v227_v4 = vpop.xlane.xlu0 %226 }
  0x8e   : > { %v228_v5 = vmul.f32 0.00390625, %v227_v4 }
  0x90   : > { %v233_v6 = vmul.f32 %v229_v3, %v228_v5 }
  0x92   : > { %v235_v7 = vsel %vm234_vm0, %v233_v6, 0.0 }
  0x93   : > { %v236_v8 = vrot.slane %v235_v7, 4 }
  0x95   : > { %v237_v9 = vadd.f32 %v236_v8, %v235_v7 }
  0x97   : > { %v238_v10 = vrot.slane %v237_v9, 2 }
  0x99   : > { %v239_v11 = vadd.f32 %v238_v10, %v237_v9 }
  0x9b   : > { %v240_v12 = vrot.slane %v239_v11, 1 }
  0x9d   : > { %v241_v14 = vadd.f32 %v240_v12, %v239_v11 }
  0x9f   : > { %v242_v15 = vadd.f32 %v241_v14, %v230_v13 }
  0xa1   : > { %vm243_vm1 = vcmp.ge.f32.partialorder %v242_v15, 0.0  ;;  %v244_v16 = vmul.f32 0.1, %v242_v15 }
  0xa3   : > { %v245_v18 = vsel %vm243_vm1, %v242_v15, %v244_v16 }
  0xa4   : > { %v246_v19 = vperm.slane %v245_v18, 0 }
  0xa6   : > { %v247_v20 = vmul.f32 %v246_v19, %v231_v17 }
  0xa8   : > { %v248_v21 = vsel %vm234_vm0, %v247_v20, 0.0 }
  0xa9   : > { %249 = vadd.xlane.f32.xlu0 %v248_v21 }
 0x11c   : > { %v250_v24 = vpop.xlane.xlu0 %249 }
 0x11d   : > { %v251_v25 = vadd.f32 %v250_v24, %v232_v23 }
 0x11f   : > { %v252_v26 = vsub.f32 0.0, %v251_v25 }
 0x121   : > { %v253_v27 = vmul.f32 1.442695, %v252_v26 }
 0x123   : > { %412 = vpow2.f32 %v253_v27 }
 0x129   : > { %v413_v28 = vpop.eup %412 }
 0x12a   : > { %v255_v29 = vadd.f32 1.0, %v413_v28 }
 0x12c   : > { %414 = vrcp.f32 %v255_v29  ;;  %v267_v33 = vand.u32 2147483648, %v255_v29  ;;  %v265_v35 = vand.u32 2147483647, %v255_v29  ;;  %vm261_vm3 = vweird.f32 %v255_v29 }
 0x12e   : > { %v268_v37 = vor.u32 1.1754944e-38, %v267_v33  ;;  %vm266_vm5 = vcmp.eq.f32.partialorder %v265_v35, 8.507059e+37 }
 0x132   : > { %v415_v30 = vpop.eup %414 }
 0x133   : > { %v257_v31 = vmul.f32 %v415_v30, %v255_v29  ;;  %vm262_vm2 = vweird.f32 %v415_v30 }
 0x134   : > { %vm263_vm4 = vmor %vm261_vm3, %vm262_vm2 }
 0x135   : > { %v258_v32 = vsub.f32 1.0, %v257_v31 }
 0x137   : > { %v259_v34 = vmul.f32 %v415_v30, %v258_v32 }
 0x139   : > { %v260_v36 = vadd.f32 %v415_v30, %v259_v34 }
 0x13b   : > { %v264_v38 = vsel %vm263_vm4, %v415_v30, %v260_v36 }
 0x13c   : > { %v269_v39 = vsel %vm266_vm5, %v268_v37, %v264_v38 }
 0x13d   : > { %273 = vperm.xlu1 %410, %v269_v39  }
 0x1af   : > { %v274_v40 = vpop.permute.xlu1 %273 }
 0x1b0   : > { %v276_v41 = vmul.f32 %v274_v40, %v223_v0  ;;  %v277_v42 = vmul.f32 %v274_v40, %v224_v1 }
 0x1b2   : > { %278 = vst [vmem:[%s217_s8] sm:$0xff] %v276_v41 }
 0x1b3   : > { %279 = vst [vmem:[%s217_s8 + $0x8] sm:$0xff] %v277_v42 }
 0x1b4   : > { %443 = shalt.err (!%p440_p3)
}
 0x1b5   : > { %370 = dma.vmem_to_hbm [thread:$0]  (%p549_p5), %s295_s9, 256, %s297_s10, %s281_s11  }
 0x1b6 PF: > { %p376_p4 = scmp.ge.s32.totalorder %s478_s21, 2  ;;  %s308_s23 = sand.u32 1, %s466_s18  }
 0x1b7   : > { %s309_s25 = scalar_lea.sflag [#allocation3], %s308_s23 }
 0x1b8   : > { %p373_p7 = pnand %p376_p4, %p553_p6 }
 0x1ba   : > { %p374_p8 = pneg %p373_p7 }
 0x1bc   : > { %461 = dma.done.wait (%p374_p8), %s309_s25, 256  }
 0x1bd   : > { %463 = vsyncadd (%p374_p8), %s309_s25, 4294967040  ;;  %p15_p9 = scmp.ge.s32.totalorder %s536_s24, 4   ;;  %s618_s18 = smov %s470_s19 }
 0x1be   : > { %s619_s19 = smov %s474_s20  ;;  %s620_s20 = smov %s547_s27 }
 0x1bf   : > { %s621_s21 = smov %s536_s24  ;;  %17 = sbr.rel (!%p15_p9) target bundleno = 3 (0x3), region = 75 }
 0x1c4   :  { %315 = vsyncpa [#allocation3], 1 }
 0x1c5   :  { %317 = vsyncpa [#allocation3 + $0x1], 1 }

</bundles_post_ra>
